<compile_context>
chip_gen: v5e
topology: v5e:2x2
jax: 0.10.0
libtpu: 0.0.40
codegen_flags: <defaults>
</compile_context>

<pallas_src>
import functools
import math

import jax
import jax.numpy as jnp
from jax.experimental import pallas as pl
from jax.experimental.pallas import tpu as pltpu

EPSILON = 1e-08
_LANE = 128
# Per-stream block target: ~2 MiB of f32-equivalent elements.  Double-buffered
# footprint: 3 streams x 2 buffers x <=2 MiB = <=12 MiB (plus compute
# temporaries), inside the 32 MiB cap used for v7x and comfortably inside the
# 64 MiB granted on v5e/v6e.
_TARGET_BLOCK_ELEMS = 512 * 1024


def _pcc_kernel(x_ref, t_ref, m_ref, o_ref,
                sum_m, sum_x, sum_t, sum_xt, sum_xx, sum_tt,
                *, n_total, epsilon):
    s = pl.program_id(1)   # feature-tile axis (reduction)
    c = pl.program_id(2)   # channel-repeat axis (reduction, innermost so the
                           # channel-shared mask tile is reused without re-DMA)
    ns = pl.num_programs(1)
    nc = pl.num_programs(2)

    @pl.when((s == 0) & (c == 0))
    def _init():
        for acc in (sum_m, sum_x, sum_t, sum_xt, sum_xx, sum_tt):
            acc[...] = jnp.zeros_like(acc)

    # Accumulate in f32 regardless of the HBM dtype (bf16 stays bf16 in HBM;
    # widening happens on-chip).
    x = x_ref[...].astype(jnp.float32)
    t = t_ref[...].astype(jnp.float32)
    m = m_ref[...].astype(jnp.float32)
    mx = x * m
    mt = t * m

    sum_m[...] += jnp.sum(m, axis=-1, keepdims=True)
    sum_x[...] += jnp.sum(mx, axis=-1, keepdims=True)
    sum_t[...] += jnp.sum(mt, axis=-1, keepdims=True)
    sum_xt[...] += jnp.sum(mx * mt, axis=-1, keepdims=True)
    sum_xx[...] += jnp.sum(mx * mx, axis=-1, keepdims=True)
    sum_tt[...] += jnp.sum(mt * mt, axis=-1, keepdims=True)

    @pl.when((s == ns - 1) & (c == nc - 1))
    def _finalize():
        # n_total is exact in f32 only up to 2^24 positions; beyond that the
        # relative error is ~1e-7, negligible for a PCC.
        n = jnp.float32(n_total)
        vc = sum_m[...]
        # An all-zero mask row gives 0/0 -> NaN, matching the PyTorch
        # reference; zero-padded batch rows hit this and are sliced off.
        inv_vc = 1.0 / vc
        sx, st = sum_x[...], sum_t[...]
        mean_x = sx * inv_vc
        mean_t = st * inv_vc
        # Raw-moment expansion of the reference's "subtract mean at every
        # position": cross terms scale with n (ALL positions), not vc.
        # NOTE: single-pass raw moments in f32 can lose accuracy when
        # |mean| >> std at very large N (reference is two-pass); acceptable
        # for this module's use, and var is clamped below.
        cov = (sum_xt[...] - mean_t * sx - mean_x * st
               + n * mean_x * mean_t) * inv_vc
        var_x = (sum_xx[...] - 2.0 * mean_x * sx + n * mean_x * mean_x) * inv_vc
        var_t = (sum_tt[...] - 2.0 * mean_t * st + n * mean_t * mean_t) * inv_vc
        var_x = jnp.maximum(var_x, 0.0)   # guard raw-moment cancellation
        var_t = jnp.maximum(var_t, 0.0)
        pcc = cov / (jnp.sqrt(var_x) * jnp.sqrt(var_t) + epsilon)
        o_ref[...] = jnp.clip(pcc, -1.0, 1.0).astype(o_ref.dtype)


def _pick_tb(b):
    """Batch rows per block.

    Multiple of 8 when the batch allows it (preferring >=2 batch blocks so
    v7x's two TensorCores both get work); otherwise the full batch (a sublane
    block equal to the array dim is always legal), so small batches are never
    host-padded/copied.
    """
    if b % 8 == 0:
        for tb in (32, 24, 16, 8):
            if b % tb == 0 and (b // tb >= 2 or tb == 8):
                return tb, b
        return 8, b
    if b <= 64:
        return b, b
    b_pad = -(-b // 8) * 8            # rare: pad <8 all-zero-mask rows
    tb, _ = _pick_tb(b_pad)
    return tb, b_pad


def _pick_tile(s_extent, tb, target_elems):
    """Feature-tile width (lanes) and padded feature extent.

    Targets ~target_elems elements per block.  Prefers a multiple-of-128
    divisor of the extent (no host-side pad copy); otherwise zero-pads the
    feature axis up to a multiple of a 128-aligned tile.
    """
    cap = max(_LANE, (target_elems // tb) // _LANE * _LANE)
    if s_extent <= cap:
        return s_extent, s_extent          # single full-extent feature block
    t = cap
    while t >= max(_LANE, cap // 2):       # accept divisors within 2x of target
        if s_extent % t == 0:
            return t, s_extent
        t -= _LANE
    s_blocks = -(-s_extent // cap)
    tile = -(-s_extent // (s_blocks * _LANE)) * _LANE
    return tile, s_blocks * tile


def _vmem_limit_bytes():
    """Generation-aware scoped-VMEM limit: ~half of physical VMEM clamped to
    [32 MiB, 64 MiB] (v7x: 64 MiB physical -> 32 MiB; v5e/v6e: 128 -> 64)."""
    try:
        cap = pltpu.get_tpu_info().vmem_capacity_bytes
    except Exception:
        cap = 64 << 20
    return int(min(64 << 20, max(32 << 20, cap // 2)))


def pearson_correlation_coefficient(inp, target, dynamic_mask, epsilon=EPSILON,
                                    *, block_elems=_TARGET_BLOCK_ELEMS):
    inp = jnp.asarray(inp)
    target = jnp.asarray(target)
    assert inp.shape == target.shape
    B = inp.shape[0]
    C = inp.shape[1] if inp.ndim >= 2 else 1
    spatial = inp.shape[2:]
    HW = math.prod(spatial) if spatial else 1
    N = C * HW                       # positions per batch row (reference's "-1")

    m = jnp.asarray(dynamic_mask)
    tb, B_pad = _pick_tb(B)

    # Channel-shared mask (the usual (B,1,H,W) case): stream only (B, HW) and
    # reuse each spatial tile for every channel grid step (mask bytes / C).
    channel_shared = (inp.ndim >= 2 and m.ndim == inp.ndim and m.shape[1] == 1
                      and C > 1 and HW % _LANE == 0)

    S, c_rep = (HW, C) if channel_shared else (N, 1)
    tile_s, S_pad = _pick_tile(S, tb, block_elems)
    s_blocks = S_pad // tile_s

    if channel_shared:
        m2d = jnp.broadcast_to(m, (B, 1) + spatial).reshape(B, HW)
        m2d = m2d.astype(inp.dtype)          # stream the mask at input width
        if S_pad != HW:
            # Rare: no good divisor of HW -> zero-pad each channel segment.
            pad3 = ((0, 0), (0, 0), (0, S_pad - HW))
            x2d = jnp.pad(inp.reshape(B, C, HW), pad3).reshape(B, C * S_pad)
            t2d = jnp.pad(target.reshape(B, C, HW), pad3).reshape(B, C * S_pad)
            m2d = jnp.pad(m2d, ((0, 0), (0, S_pad - HW)))
        else:
            x2d = inp.reshape(B, N)
            t2d = target.reshape(B, N)
    else:
        # Fallback (mask not (B,1,...) or HW not lane-aligned): stream a full
        # (B, N) mask, but at the *input* dtype (not f32) to keep bytes down.
        x2d = inp.reshape(B, N)
        t2d = target.reshape(B, N)
        m2d = jnp.broadcast_to(m, inp.shape).reshape(B, N).astype(inp.dtype)
        if S_pad != N:
            pad2 = ((0, 0), (0, S_pad - N))
            x2d = jnp.pad(x2d, pad2)
            t2d = jnp.pad(t2d, pad2)
            m2d = jnp.pad(m2d, pad2)

    if B_pad != B:   # only for large batches that are not multiples of 8
        padb = ((0, B_pad - B), (0, 0))
        x2d = jnp.pad(x2d, padb)
        t2d = jnp.pad(t2d, padb)
        m2d = jnp.pad(m2d, padb)   # zero-mask rows -> NaN pcc, sliced off below

    kernel = functools.partial(_pcc_kernel, n_total=float(N),
                               epsilon=float(epsilon))

    xt_spec = pl.BlockSpec((tb, tile_s), lambda b, s, c: (b, c * s_blocks + s))
    m_spec = pl.BlockSpec((tb, tile_s), lambda b, s, c: (b, s))
    out_spec = pl.BlockSpec((tb, 1), lambda b, s, c: (b, 0))

    out = pl.pallas_call(
        kernel,
        out_shape=jax.ShapeDtypeStruct((B_pad, 1), jnp.float32),
        grid_spec=pltpu.PrefetchScalarGridSpec(
            num_scalar_prefetch=0,
            grid=(B_pad // tb, s_blocks, c_rep),
            in_specs=[xt_spec, xt_spec, m_spec],
            out_specs=out_spec,
            scratch_shapes=[pltpu.VMEM((tb, 1), jnp.float32)] * 6,
        ),
        compiler_params=pltpu.CompilerParams(
            dimension_semantics=("parallel", "arbitrary", "arbitrary"),
            vmem_limit_bytes=_vmem_limit_bytes()),
    )(x2d, t2d, m2d)
    return out[:B, 0]


def _reference(inp, target, dynamic_mask, epsilon=EPSILON):
    """Pure-JAX two-pass reference matching the PyTorch module."""
    mask = jnp.broadcast_to(dynamic_mask, inp.shape).astype(jnp.float32)
    B = inp.shape[0]
    x = inp.astype(jnp.float32)
    t = target.astype(jnp.float32)
    mi = (x * mask).reshape(B, -1)
    mt = (t * mask).reshape(B, -1)
    mf = mask.reshape(B, -1)
    vc = mf.sum(1)
    mean_i = mi.sum(1) / vc
    mean_t = mt.sum(1) / vc
    di = mi - mean_i[:, None]
    dt = mt - mean_t[:, None]
    cov = (di * dt).sum(1) / vc
    vi = (di ** 2).sum(1) / vc
    vt = (dt ** 2).sum(1) / vc
    pcc = cov / (jnp.sqrt(vi) * jnp.sqrt(vt) + epsilon)
    return jnp.clip(pcc, -1.0, 1.0)


if __name__ == "__main__":
    key = jax.random.PRNGKey(0)
    k1, k2, k3 = jax.random.split(key, 3)

    B, C, H, W = 2, 4, 16, 16
    inp = jax.random.normal(k1, (B, C, H, W), dtype=jnp.float32)
    target = 0.5 * inp + 0.5 * jax.random.normal(k2, (B, C, H, W),
                                                 dtype=jnp.float32)
    dynamic_mask = (jax.random.uniform(k3, (B, 1, H, W)) > 0.3).astype(jnp.float32)

    ref = _reference(inp, target, dynamic_mask)

    # 1) channel-shared mask path (single feature block, no batch padding).
    pcc = jax.block_until_ready(
        pearson_correlation_coefficient(inp, target, dynamic_mask))
    assert pcc.shape == (B,) and pcc.dtype == jnp.float32
    assert jnp.allclose(pcc, ref, atol=1e-5, rtol=1e-5), (pcc, ref)

    # 2) fallback path: mask already expanded to the full input shape.
    full_mask = jnp.broadcast_to(dynamic_mask, inp.shape)
    pcc2 = jax.block_until_ready(
        pearson_correlation_coefficient(inp, target, full_mask))
    assert jnp.allclose(pcc2, ref, atol=1e-5, rtol=1e-5), (pcc2, ref)

    # 3) multi-step accumulation across feature tiles and channel repeats
    #    (small block_elems override exercises the tiling machinery).
    pcc3 = jax.block_until_ready(
        pearson_correlation_coefficient(inp, target, dynamic_mask,
                                        block_elems=256))
    assert jnp.allclose(pcc3, ref, atol=1e-5, rtol=1e-5), (pcc3, ref)

    # 4) feature-axis zero-padding path (no 128-aligned divisor of N).
    B2, C2, H2, W2 = 2, 3, 7, 7
    ka, kb, kc = jax.random.split(jax.random.PRNGKey(1), 3)
    inp2 = jax.random.normal(ka, (B2, C2, H2, W2), dtype=jnp.float32)
    tgt2 = jax.random.normal(kb, (B2, C2, H2, W2), dtype=jnp.float32)
    msk2 = (jax.random.uniform(kc, (B2, 1, H2, W2)) > 0.4).astype(jnp.float32)
    ref2 = _reference(inp2, tgt2, msk2)
    pcc4 = jax.block_until_ready(
        pearson_correlation_coefficient(inp2, tgt2, msk2, block_elems=128))
    assert jnp.allclose(pcc4, ref2, atol=1e-5, rtol=1e-5), (pcc4, ref2)

    # 5) bf16 inputs: bf16 mask stream, f32 accumulation, f32 output.
    inp_bf = inp.astype(jnp.bfloat16)
    tgt_bf = target.astype(jnp.bfloat16)
    ref_bf = _reference(inp_bf, tgt_bf, dynamic_mask)
    pcc5 = jax.block_until_ready(
        pearson_correlation_coefficient(inp_bf, tgt_bf, dynamic_mask))
    assert pcc5.dtype == jnp.float32
    assert jnp.allclose(pcc5, ref_bf, atol=2e-3, rtol=2e-3), (pcc5, ref_bf)

    print("KERNEL_OK")
</pallas_src>

<mosaic_0001>
module attributes {stable_mosaic.version = 11 : i64} {
  func.func @_pcc_kernel(%arg0: i32, %arg1: i32, %arg2: i32, %arg3: memref<2x256xf32, #tpu.memory_space<vmem>>, %arg4: memref<2x256xf32, #tpu.memory_space<vmem>>, %arg5: memref<2x256xf32, #tpu.memory_space<vmem>>, %arg6: memref<2x1xf32, #tpu.memory_space<vmem>>, %arg7: memref<2x1xf32, #tpu.memory_space<vmem>>, %arg8: memref<2x1xf32, #tpu.memory_space<vmem>>, %arg9: memref<2x1xf32, #tpu.memory_space<vmem>>, %arg10: memref<2x1xf32, #tpu.memory_space<vmem>>, %arg11: memref<2x1xf32, #tpu.memory_space<vmem>>, %arg12: memref<2x1xf32, #tpu.memory_space<vmem>>) attributes {dimension_semantics = [#tpu.dimension_semantics<parallel>, #tpu.dimension_semantics<arbitrary>, #tpu.dimension_semantics<arbitrary>], iteration_bounds = array<i64: 1, 1, 4>, scalar_prefetch = 0 : i64, scratch_operands = 6 : i64, tpu.core_type = #tpu.core_type<tc>, window_params = [{transform_indices = @transform_0, window_bounds = array<i64: 2, 256>}, {transform_indices = @transform_1, window_bounds = array<i64: 2, 256>}, {transform_indices = @transform_2, window_bounds = array<i64: 2, 256>}, {transform_indices = @transform_3, window_bounds = array<i64: 2, 1>}]} {
    %c0_i32 = arith.constant 0 : i32
    %0 = arith.cmpi eq, %arg1, %c0_i32 : i32
    %c0_i32_0 = arith.constant 0 : i32
    %1 = arith.cmpi eq, %arg2, %c0_i32_0 : i32
    %2 = arith.andi %0, %1 : i1
    %3 = arith.extui %2 : i1 to i32
    %c0_i32_1 = arith.constant 0 : i32
    %4 = arith.cmpi ne, %3, %c0_i32_1 : i32
    scf.if %4 {
      %cst_38 = arith.constant 0.000000e+00 : f32
      %48 = vector.broadcast %cst_38 : f32 to vector<2x1xf32>
      %c0_39 = arith.constant 0 : index
      %c0_40 = arith.constant 0 : index
      %49 = vector.load %arg7[%c0_39, %c0_40] : memref<2x1xf32, #tpu.memory_space<vmem>>, vector<2x1xf32>
      tpu.vector_store %arg7[%c0_39, %c0_40], %48 {strides = array<i32>} : memref<2x1xf32, #tpu.memory_space<vmem>>, vector<2x1xf32>,
      %cst_41 = arith.constant 0.000000e+00 : f32
      %50 = vector.broadcast %cst_41 : f32 to vector<2x1xf32>
      %c0_42 = arith.constant 0 : index
      %c0_43 = arith.constant 0 : index
      %51 = vector.load %arg8[%c0_42, %c0_43] : memref<2x1xf32, #tpu.memory_space<vmem>>, vector<2x1xf32>
      tpu.vector_store %arg8[%c0_42, %c0_43], %50 {strides = array<i32>} : memref<2x1xf32, #tpu.memory_space<vmem>>, vector<2x1xf32>,
      %cst_44 = arith.constant 0.000000e+00 : f32
      %52 = vector.broadcast %cst_44 : f32 to vector<2x1xf32>
      %c0_45 = arith.constant 0 : index
      %c0_46 = arith.constant 0 : index
      %53 = vector.load %arg9[%c0_45, %c0_46] : memref<2x1xf32, #tpu.memory_space<vmem>>, vector<2x1xf32>
      tpu.vector_store %arg9[%c0_45, %c0_46], %52 {strides = array<i32>} : memref<2x1xf32, #tpu.memory_space<vmem>>, vector<2x1xf32>,
      %cst_47 = arith.constant 0.000000e+00 : f32
      %54 = vector.broadcast %cst_47 : f32 to vector<2x1xf32>
      %c0_48 = arith.constant 0 : index
      %c0_49 = arith.constant 0 : index
      %55 = vector.load %arg10[%c0_48, %c0_49] : memref<2x1xf32, #tpu.memory_space<vmem>>, vector<2x1xf32>
      tpu.vector_store %arg10[%c0_48, %c0_49], %54 {strides = array<i32>} : memref<2x1xf32, #tpu.memory_space<vmem>>, vector<2x1xf32>,
      %cst_50 = arith.constant 0.000000e+00 : f32
      %56 = vector.broadcast %cst_50 : f32 to vector<2x1xf32>
      %c0_51 = arith.constant 0 : index
      %c0_52 = arith.constant 0 : index
      %57 = vector.load %arg11[%c0_51, %c0_52] : memref<2x1xf32, #tpu.memory_space<vmem>>, vector<2x1xf32>
      tpu.vector_store %arg11[%c0_51, %c0_52], %56 {strides = array<i32>} : memref<2x1xf32, #tpu.memory_space<vmem>>, vector<2x1xf32>,
      %cst_53 = arith.constant 0.000000e+00 : f32
      %58 = vector.broadcast %cst_53 : f32 to vector<2x1xf32>
      %c0_54 = arith.constant 0 : index
      %c0_55 = arith.constant 0 : index
      %59 = vector.load %arg12[%c0_54, %c0_55] : memref<2x1xf32, #tpu.memory_space<vmem>>, vector<2x1xf32>
      tpu.vector_store %arg12[%c0_54, %c0_55], %58 {strides = array<i32>} : memref<2x1xf32, #tpu.memory_space<vmem>>, vector<2x1xf32>,
    } else {
    }
    %c0 = arith.constant 0 : index
    %c0_2 = arith.constant 0 : index
    %5 = vector.load %arg3[%c0, %c0_2] : memref<2x256xf32, #tpu.memory_space<vmem>>, vector<2x256xf32>
    %c0_3 = arith.constant 0 : index
    %c0_4 = arith.constant 0 : index
    %6 = vector.load %arg4[%c0_3, %c0_4] : memref<2x256xf32, #tpu.memory_space<vmem>>, vector<2x256xf32>
    %c0_5 = arith.constant 0 : index
    %c0_6 = arith.constant 0 : index
    %7 = vector.load %arg5[%c0_5, %c0_6] : memref<2x256xf32, #tpu.memory_space<vmem>>, vector<2x256xf32>
    %8 = arith.mulf %5, %7 : vector<2x256xf32>
    %9 = arith.mulf %6, %7 : vector<2x256xf32>
    %c0_7 = arith.constant 0 : index
    %c0_8 = arith.constant 0 : index
    %10 = vector.load %arg7[%c0_7, %c0_8] : memref<2x1xf32, #tpu.memory_space<vmem>>, vector<2x1xf32>
    %cst = arith.constant dense<0.000000e+00> : vector<2xf32>
    %11 = vector.multi_reduction <add>, %7, %cst [1] : vector<2x256xf32> to vector<2xf32>
    %12 = vector.shape_cast %11 : vector<2xf32> to vector<2x1xf32>
    %13 = arith.addf %10, %12 : vector<2x1xf32>
    %c0_9 = arith.constant 0 : index
    %c0_10 = arith.constant 0 : index
    %14 = vector.load %arg7[%c0_9, %c0_10] : memref<2x1xf32, #tpu.memory_space<vmem>>, vector<2x1xf32>
    tpu.vector_store %arg7[%c0_9, %c0_10], %13 {strides = array<i32>} : memref<2x1xf32, #tpu.memory_space<vmem>>, vector<2x1xf32>,
    %c0_11 = arith.constant 0 : index
    %c0_12 = arith.constant 0 : index
    %15 = vector.load %arg8[%c0_11, %c0_12] : memref<2x1xf32, #tpu.memory_space<vmem>>, vector<2x1xf32>
    %cst_13 = arith.constant dense<0.000000e+00> : vector<2xf32>
    %16 = vector.multi_reduction <add>, %8, %cst_13 [1] : vector<2x256xf32> to vector<2xf32>
    %17 = vector.shape_cast %16 : vector<2xf32> to vector<2x1xf32>
    %18 = arith.addf %15, %17 : vector<2x1xf32>
    %c0_14 = arith.constant 0 : index
    %c0_15 = arith.constant 0 : index
    %19 = vector.load %arg8[%c0_14, %c0_15] : memref<2x1xf32, #tpu.memory_space<vmem>>, vector<2x1xf32>
    tpu.vector_store %arg8[%c0_14, %c0_15], %18 {strides = array<i32>} : memref<2x1xf32, #tpu.memory_space<vmem>>, vector<2x1xf32>,
    %c0_16 = arith.constant 0 : index
    %c0_17 = arith.constant 0 : index
    %20 = vector.load %arg9[%c0_16, %c0_17] : memref<2x1xf32, #tpu.memory_space<vmem>>, vector<2x1xf32>
    %cst_18 = arith.constant dense<0.000000e+00> : vector<2xf32>
    %21 = vector.multi_reduction <add>, %9, %cst_18 [1] : vector<2x256xf32> to vector<2xf32>
    %22 = vector.shape_cast %21 : vector<2xf32> to vector<2x1xf32>
    %23 = arith.addf %20, %22 : vector<2x1xf32>
    %c0_19 = arith.constant 0 : index
    %c0_20 = arith.constant 0 : index
    %24 = vector.load %arg9[%c0_19, %c0_20] : memref<2x1xf32, #tpu.memory_space<vmem>>, vector<2x1xf32>
    tpu.vector_store %arg9[%c0_19, %c0_20], %23 {strides = array<i32>} : memref<2x1xf32, #tpu.memory_space<vmem>>, vector<2x1xf32>,
    %c0_21 = arith.constant 0 : index
    %c0_22 = arith.constant 0 : index
    %25 = vector.load %arg10[%c0_21, %c0_22] : memref<2x1xf32, #tpu.memory_space<vmem>>, vector<2x1xf32>
    %26 = arith.mulf %8, %9 : vector<2x256xf32>
    %cst_23 = arith.constant dense<0.000000e+00> : vector<2xf32>
    %27 = vector.multi_reduction <add>, %26, %cst_23 [1] : vector<2x256xf32> to vector<2xf32>
    %28 = vector.shape_cast %27 : vector<2xf32> to vector<2x1xf32>
    %29 = arith.addf %25, %28 : vector<2x1xf32>
    %c0_24 = arith.constant 0 : index
    %c0_25 = arith.constant 0 : index
    %30 = vector.load %arg10[%c0_24, %c0_25] : memref<2x1xf32, #tpu.memory_space<vmem>>, vector<2x1xf32>
    tpu.vector_store %arg10[%c0_24, %c0_25], %29 {strides = array<i32>} : memref<2x1xf32, #tpu.memory_space<vmem>>, vector<2x1xf32>,
    %c0_26 = arith.constant 0 : index
    %c0_27 = arith.constant 0 : index
    %31 = vector.load %arg11[%c0_26, %c0_27] : memref<2x1xf32, #tpu.memory_space<vmem>>, vector<2x1xf32>
    %32 = arith.mulf %8, %8 : vector<2x256xf32>
    %cst_28 = arith.constant dense<0.000000e+00> : vector<2xf32>
    %33 = vector.multi_reduction <add>, %32, %cst_28 [1] : vector<2x256xf32> to vector<2xf32>
    %34 = vector.shape_cast %33 : vector<2xf32> to vector<2x1xf32>
    %35 = arith.addf %31, %34 : vector<2x1xf32>
    %c0_29 = arith.constant 0 : index
    %c0_30 = arith.constant 0 : index
    %36 = vector.load %arg11[%c0_29, %c0_30] : memref<2x1xf32, #tpu.memory_space<vmem>>, vector<2x1xf32>
    tpu.vector_store %arg11[%c0_29, %c0_30], %35 {strides = array<i32>} : memref<2x1xf32, #tpu.memory_space<vmem>>, vector<2x1xf32>,
    %c0_31 = arith.constant 0 : index
    %c0_32 = arith.constant 0 : index
    %37 = vector.load %arg12[%c0_31, %c0_32] : memref<2x1xf32, #tpu.memory_space<vmem>>, vector<2x1xf32>
    %38 = arith.mulf %9, %9 : vector<2x256xf32>
    %cst_33 = arith.constant dense<0.000000e+00> : vector<2xf32>
    %39 = vector.multi_reduction <add>, %38, %cst_33 [1] : vector<2x256xf32> to vector<2xf32>
    %40 = vector.shape_cast %39 : vector<2xf32> to vector<2x1xf32>
    %41 = arith.addf %37, %40 : vector<2x1xf32>
    %c0_34 = arith.constant 0 : index
    %c0_35 = arith.constant 0 : index
    %42 = vector.load %arg12[%c0_34, %c0_35] : memref<2x1xf32, #tpu.memory_space<vmem>>, vector<2x1xf32>
    tpu.vector_store %arg12[%c0_34, %c0_35], %41 {strides = array<i32>} : memref<2x1xf32, #tpu.memory_space<vmem>>, vector<2x1xf32>,
    %c0_i32_36 = arith.constant 0 : i32
    %43 = arith.cmpi eq, %arg1, %c0_i32_36 : i32
    %c3_i32 = arith.constant 3 : i32
    %44 = arith.cmpi eq, %arg2, %c3_i32 : i32
    %45 = arith.andi %43, %44 : i1
    %46 = arith.extui %45 : i1 to i32
    %c0_i32_37 = arith.constant 0 : i32
    %47 = arith.cmpi ne, %46, %c0_i32_37 : i32
    scf.if %47 {
      %c0_38 = arith.constant 0 : index
      %c0_39 = arith.constant 0 : index
      %48 = vector.load %arg7[%c0_38, %c0_39] : memref<2x1xf32, #tpu.memory_space<vmem>>, vector<2x1xf32>
      %cst_40 = arith.constant 1.000000e+00 : f32
      %49 = vector.broadcast %cst_40 : f32 to vector<2x1xf32>
      %50 = arith.divf %49, %48 : vector<2x1xf32>
      %c0_41 = arith.constant 0 : index
      %c0_42 = arith.constant 0 : index
      %51 = vector.load %arg8[%c0_41, %c0_42] : memref<2x1xf32, #tpu.memory_space<vmem>>, vector<2x1xf32>
      %c0_43 = arith.constant 0 : index
      %c0_44 = arith.constant 0 : index
      %52 = vector.load %arg9[%c0_43, %c0_44] : memref<2x1xf32, #tpu.memory_space<vmem>>, vector<2x1xf32>
      %53 = arith.mulf %51, %50 : vector<2x1xf32>
      %54 = arith.mulf %52, %50 : vector<2x1xf32>
      %c0_45 = arith.constant 0 : index
      %c0_46 = arith.constant 0 : index
      %55 = vector.load %arg10[%c0_45, %c0_46] : memref<2x1xf32, #tpu.memory_space<vmem>>, vector<2x1xf32>
      %56 = arith.mulf %54, %51 : vector<2x1xf32>
      %57 = arith.subf %55, %56 : vector<2x1xf32>
      %58 = arith.mulf %53, %52 : vector<2x1xf32>
      %59 = arith.subf %57, %58 : vector<2x1xf32>
      %cst_47 = arith.constant 1.024000e+03 : f32
      %60 = vector.broadcast %cst_47 : f32 to vector<2x1xf32>
      %61 = arith.mulf %60, %53 : vector<2x1xf32>
      %62 = arith.mulf %61, %54 : vector<2x1xf32>
      %63 = arith.addf %59, %62 : vector<2x1xf32>
      %64 = arith.mulf %63, %50 : vector<2x1xf32>
      %c0_48 = arith.constant 0 : index
      %c0_49 = arith.constant 0 : index
      %65 = vector.load %arg11[%c0_48, %c0_49] : memref<2x1xf32, #tpu.memory_space<vmem>>, vector<2x1xf32>
      %cst_50 = arith.constant 2.000000e+00 : f32
      %66 = vector.broadcast %cst_50 : f32 to vector<2x1xf32>
      %67 = arith.mulf %66, %53 : vector<2x1xf32>
      %68 = arith.mulf %67, %51 : vector<2x1xf32>
      %69 = arith.subf %65, %68 : vector<2x1xf32>
      %cst_51 = arith.constant 1.024000e+03 : f32
      %70 = vector.broadcast %cst_51 : f32 to vector<2x1xf32>
      %71 = arith.mulf %70, %53 : vector<2x1xf32>
      %72 = arith.mulf %71, %53 : vector<2x1xf32>
      %73 = arith.addf %69, %72 : vector<2x1xf32>
      %74 = arith.mulf %73, %50 : vector<2x1xf32>
      %c0_52 = arith.constant 0 : index
      %c0_53 = arith.constant 0 : index
      %75 = vector.load %arg12[%c0_52, %c0_53] : memref<2x1xf32, #tpu.memory_space<vmem>>, vector<2x1xf32>
      %cst_54 = arith.constant 2.000000e+00 : f32
      %76 = vector.broadcast %cst_54 : f32 to vector<2x1xf32>
      %77 = arith.mulf %76, %54 : vector<2x1xf32>
      %78 = arith.mulf %77, %52 : vector<2x1xf32>
      %79 = arith.subf %75, %78 : vector<2x1xf32>
      %cst_55 = arith.constant 1.024000e+03 : f32
      %80 = vector.broadcast %cst_55 : f32 to vector<2x1xf32>
      %81 = arith.mulf %80, %54 : vector<2x1xf32>
      %82 = arith.mulf %81, %54 : vector<2x1xf32>
      %83 = arith.addf %79, %82 : vector<2x1xf32>
      %84 = arith.mulf %83, %50 : vector<2x1xf32>
      %cst_56 = arith.constant 0.000000e+00 : f32
      %85 = vector.broadcast %cst_56 : f32 to vector<2x1xf32>
      %86 = arith.maximumf %74, %85 : vector<2x1xf32>
      %cst_57 = arith.constant 0.000000e+00 : f32
      %87 = vector.broadcast %cst_57 : f32 to vector<2x1xf32>
      %88 = arith.maximumf %84, %87 : vector<2x1xf32>
      %89 = math.sqrt %86 : vector<2x1xf32>
      %90 = math.sqrt %88 : vector<2x1xf32>
      %91 = arith.mulf %89, %90 : vector<2x1xf32>
      %cst_58 = arith.constant 9.99999993E-9 : f32
      %92 = vector.broadcast %cst_58 : f32 to vector<2x1xf32>
      %93 = arith.addf %91, %92 : vector<2x1xf32>
      %94 = arith.divf %64, %93 : vector<2x1xf32>
      %cst_59 = arith.constant -1.000000e+00 : f32
      %cst_60 = arith.constant 1.000000e+00 : f32
      %95 = vector.broadcast %cst_59 : f32 to vector<2x1xf32>
      %96 = arith.maximumf %95, %94 : vector<2x1xf32>
      %97 = vector.broadcast %cst_60 : f32 to vector<2x1xf32>
      %98 = arith.minimumf %97, %96 : vector<2x1xf32>
      %c0_61 = arith.constant 0 : index
      %c0_62 = arith.constant 0 : index
      %99 = vector.load %arg6[%c0_61, %c0_62] : memref<2x1xf32, #tpu.memory_space<vmem>>, vector<2x1xf32>
      tpu.vector_store %arg6[%c0_61, %c0_62], %98 {strides = array<i32>} : memref<2x1xf32, #tpu.memory_space<vmem>>, vector<2x1xf32>,
    } else {
    }
    return
  }
  func.func @transform_0(%arg0: i32, %arg1: i32, %arg2: i32) -> (i32, i32) {
    %c1_i32 = arith.constant 1 : i32
    %0 = arith.muli %arg2, %c1_i32 : i32
    %1 = arith.addi %0, %arg1 : i32
    %c0_i32 = arith.constant 0 : i32
    return %arg0, %1 : i32, i32
  }
  func.func @transform_1(%arg0: i32, %arg1: i32, %arg2: i32) -> (i32, i32) {
    %c1_i32 = arith.constant 1 : i32
    %0 = arith.muli %arg2, %c1_i32 : i32
    %1 = arith.addi %0, %arg1 : i32
    %c0_i32 = arith.constant 0 : i32
    return %arg0, %1 : i32, i32
  }
  func.func @transform_2(%arg0: i32, %arg1: i32, %arg2: i32) -> (i32, i32) {
    %c0_i32 = arith.constant 0 : i32
    return %arg0, %arg1 : i32, i32
  }
  func.func @transform_3(%arg0: i32, %arg1: i32, %arg2: i32) -> (i32, i32) {
    %c0_i32 = arith.constant 0 : i32
    %c0_i32_0 = arith.constant 0 : i32
    return %arg0, %c0_i32 : i32, i32
  }
}

</mosaic_0001>

<bundles_post_ra>
// kernel: tpu_custom_call.1
= control target key start
LH: loop header
LB: loop body
LE: loop exit
PB: predicated region body
PF: predicated region fallthrough
CT: control target
= control target key end

     0   :  { %s1046_s0 = inlined_call_operand.hbm [shape: f32[2,1024], index: 0, kind: input, shape index: {}]   ;;  %s1047_s1 = inlined_call_operand.hbm [shape: f32[2,1024], index: 1, kind: input, shape index: {}]   ;;  %s1048_s2 = inlined_call_operand.hbm [shape: f32[2,256], index: 2, kind: input, shape index: {}]   ;;  %s1049_s3 = inlined_call_operand.vmem [shape: f32[2,1], index: 3, kind: output, shape index: {}]  }
   0x1   :  { %1051 = sst [smem:[#allocation16_spill]] %s1048_s2 }
   0x2   :  { %8 = vsyncpa [#allocation9], 0 }
   0x3   :  { %10 = vsyncpa [#allocation9 + $0x1], 0 }
   0x4   :  { %11 = vsyncpa [#allocation11], 0 }
   0x5   :  { %13 = vsyncpa [#allocation11 + $0x1], 0  ;;  %s889_s12 = smov 0   ;;  %s891_s13 = smov 0  }
   0x6   :  { %s893_s14 = smov 0   ;;  %s895_s15 = smov 0  }
   0x7   :  { %s897_s16 = smov 0   ;;  %s899_s17 = smov 0  }
   0x8 LB: > { %s1050_s18 = sadd.s32 4294967295, %s865_s17   ;;  %p62_p0 = scmp.ne.s32.totalorder %s849_s13, %s845_s12  ;;  %s865_s17 = sphi %s899_s17, %s19_s17   ;;  %s861_s16 = sphi %s897_s16, %s1062_s16   ;;  %s857_s15 = sphi %s895_s15, %s1061_s15   ;;  %s853_s14 = sphi %s893_s14, %s1060_s14   ;;  %s849_s13 = sphi %s891_s13, %s1059_s13   ;;  %s845_s12 = sphi %s889_s12, %s1058_s12  }
   0x9   : > { %p921_p1 = scmp.eq.s32.totalorder %s1050_s18, 0  ;;  %p614_p2 = scmp.ge.s32.totalorder %s865_s17, 1 }
   0xa   : > { %p157_p3 = scmp.lt.s32.totalorder %s865_s17, 5  ;;  %s1054_s2 = sld [smem:[#allocation16_spill]] }
   0xb   : > { %p929_p4 = por %p921_p1, %p62_p0  ;;  %s867_s25 = smov [#allocation12]  }
   0xc   : > { %p936_p5 = pnand %p614_p2, %p157_p3  ;;  %s176_s26 = sshll.u32 %s867_s25, 4  ;;  %s177_s26 = int_to_ptr.vmem [resolvable:$true] %s176_s26 }
   0xd   : > { %s31_s27 = sadd.s32 1, %s861_s16  ;;  %s49_s28 = sadd.s32 1, %s853_s14 }
   0xe   : > { %p645_p6 = pneg %p936_p5  ;;  %p32_p8 = scmp.ge.s32.totalorder %s31_s27, 4 }
   0xf   : > { %p56_p9 = scmp.ne.s32.totalorder %s853_s14, %s849_s13  ;;  %p57_p10 = scmp.eq.s32.totalorder %s865_s17, 0 }
  0x10   : > { %s174_s23 = sshll.u32 %s1054_s2, 4  ;;  %p646_p7 = pnand %p645_p6, %p921_p1  ;;  %s175_s23 = int_to_ptr.hbm [resolvable:$true] %s174_s23 }
  0x11   : > { %s1064_s27 = smov (%p32_p8, %s31_s27), 0  ;;  %p951_p11 = por %p57_p10, %p56_p9 }
  0x12   : > { %648 = dma.hbm_to_vmem [thread:$0]  (!%p646_p7), %s175_s23, 64, %s177_s26, [#allocation11]  }
  0x13   : > { %p657_p12 = scmp.lt.s32.totalorder %s865_s17, 4  ;;  %s45_s30 = ssub.s32 %s861_s16, %s1064_s27 }
  0x14   : > { %s187_s4 = sand.u32 1, %s853_s14   ;;  %p47_p13 = scmp.eq.s32.totalorder %s45_s30, 0 }
  0x15   : > { %s617_s5 = sshll.u32 %s187_s4, 2  ;;  %s633_s6 = sshll.u32 %s861_s16, 2 }
  0x16   : > { %s961_s7 = scalar_select %p47_p13, %s853_s14, %s49_s28  }
  0x17   : > { %s199_s10 = scalar_lea.hbm %s1046_s0, %s633_s6  ;;  %s191_s12 = scalar_lea.vmem [#allocation8], %s617_s5 }
  0x18   : > { %s201_s11 = sshll.u32 %s199_s10, 4  ;;  %s203_s21 = sshll.u32 %s191_s12, 4  ;;  %s202_s11 = int_to_ptr.hbm [resolvable:$true] %s201_s11  ;;  %s204_s21 = int_to_ptr.vmem [resolvable:$true] %s203_s21 }
  0x19   : > { %p650_p0 = pnand %p657_p12, %p951_p11  ;;  %s222_s25 = scalar_lea.hbm %s1047_s1, %s633_s6 }
  0x1a   : > { %s210_s26 = sand.u32 1, %s865_s17   ;;  %s188_s30 = scalar_lea.sflag [#allocation9], %s187_s4 }
  0x1b   : > { %652 = dma.hbm_to_vmem [thread:$0]  (!%p650_p0), %s202_s11, 64, %s204_s21, %s188_s30  }
  0x1c   : > { %s224_s28 = sshll.u32 %s222_s25, 4  ;;  %s214_s18 = scalar_lea.vmem [#allocation10], %s617_s5  ;;  %s225_s28 = int_to_ptr.hbm [resolvable:$true] %s224_s28 }
  0x1d   : > { %s226_s2 = sshll.u32 %s214_s18, 4  ;;  %s211_s8 = scalar_lea.sflag [#allocation11], %s210_s26  ;;  %s227_s2 = int_to_ptr.vmem [resolvable:$true] %s226_s2 }
  0x1e   : > { %655 = dma.hbm_to_vmem [thread:$0]  (!%p650_p0), %s225_s28, 64, %s227_s2, %s211_s8  }
  0x1f   : > { %235 = sbr.rel (%p936_p5) target bundleno = 284 (0x11c), region = 32  ;;  %s237_s29 = sand.u32 (!%p936_p5), 1, %s849_s13  }
  0x20   : > { %s977_s9 = sshll.u32 (!%p936_p5), %s237_s29, 2  ;;  %s238_s6 = scalar_lea.sflag (!%p936_p5), [#allocation9], %s237_s29 }
  0x21   : > { %s241_s10 = scalar_lea.vmem (!%p936_p5), [#allocation8], %s977_s9 }
  0x24   : > { %832 = dma.done.wait (%p929_p4), %s238_s6, 64  }
  0x25   : > { %834 = vsyncadd (%p929_p4), %s238_s6, 4294967232  ;;  %s1057_s18 = sadd.s32 4294967295, %s865_s17   ;;  %s251_s4 = scalar_lea.vmem [#allocation10], %s977_s9 }
  0x26   : > { %s247_s2 = sand.u32 1, %s1057_s18  }
  0x27   : > { %s248_s24 = scalar_lea.sflag [#allocation11], %s247_s2 }
  0x28   : > { %836 = dma.done.wait (%p929_p4), %s248_s24, 64  }
  0x29   : > { %838 = vsyncadd (%p929_p4), %s248_s24, 4294967232 }
  0x2a   : > { %840 = dma.done.wait (%p921_p1), [#allocation11], 64  }
  0x2b   : > { %842 = vsyncadd (%p921_p1), [#allocation11], 4294967232  ;;  %p294_p2 = scmp.eq.s32.totalorder %s857_s15, 0 }
  0x2c   : > { %vm299_vm0 = vcmask (%p294_p2), 1024   ;;  %v868_v0 = vmov (%p294_p2), 0.0  }
  0x2d   : > { %298 = sbr.rel (!%p294_p2) target bundleno = 51 (0x33), region = 48  ;;  %300 = vst.msk [vmem:[#allocation2] sm:$0x3] (%p294_p2), %vm299_vm0, %v868_v0 }
  0x2e   : > { %301 = vst.msk [vmem:[#allocation3] sm:$0x3] (%p294_p2), %vm299_vm0, %v868_v0 }
  0x2f   : > { %302 = vst.msk [vmem:[#allocation4] sm:$0x3] (%p294_p2), %vm299_vm0, %v868_v0 }
  0x30   : > { %303 = vst.msk [vmem:[#allocation5] sm:$0x3] (%p294_p2), %vm299_vm0, %v868_v0 }
  0x31   : > { %304 = vst.msk [vmem:[#allocation6] sm:$0x3] (%p294_p2), %vm299_vm0, %v868_v0 }
  0x32   : > { %305 = vst.msk [vmem:[#allocation7] sm:$0x3] %vm299_vm0, %v868_v0 }
  0x33 PF: > { %v308_v1 = vld [vmem:[#allocation12] sm:$0xf]  ;;  %v306_v2 = vld [vmem:[%s241_s10] sm:$0xf]  ;;  %vm318_vm1 = vcmask 1041408   ;;  %p400_p1 = scmp.eq.s32.totalorder %s857_s15, 3 }
  0x34   : > { %313 = vst [vmem:[#allocation1] ss:$4 sm:$0xff] %v308_v1  ;;  %v309_v3 = vmul.f32 %v308_v1, %v306_v2  ;;  %v307_v9 = vld [vmem:[%s251_s4] sm:$0xf]  ;;  %vm325_vm2 = vcmask 1024  }
  0x35   : > { %v310_v10 = vmul.f32 %v308_v1, %v307_v9  ;;  %v311_v39 = vld [vmem:[#allocation2] sm:$0x3] }
  0x36   : > { %v371_v22 = vmul.f32 %v309_v3, %v309_v3  ;;  %v327_v42 = vld [vmem:[#allocation3] sm:$0x3] }
  0x37   : > { %v356_v16 = vmul.f32 %v310_v10, %v309_v3  ;;  %v386_v28 = vmul.f32 %v310_v10, %v310_v10  ;;  %v341_v45 = vld [vmem:[#allocation4] sm:$0x3] }
  0x38   : > { %v355_v48 = vld [vmem:[#allocation5] sm:$0x3] }
  0x39   : > { %v370_v51 = vld [vmem:[#allocation6] sm:$0x3]  ;;  %v385_v54 = vld [vmem:[#allocation7] sm:$0x3] }
  0x3b   : > { %v314_v4 = vld.sshfl [vmem:[#allocation1] sm:$0xff pattern:$0x73625140]  ;;  %v315_v5 = vld.sshfl [vmem:[#allocation1 + $0x8] sm:$0xff pattern:$0x73625140] }
  0x3c   : > { %v319_v6 = vsel %vm318_vm1, %v314_v4, 0.0  ;;  %v320_v7 = vsel %vm318_vm1, %v315_v5, 0.0  ;;  %329 = vst [vmem:[#allocation1] ss:$4 sm:$0xff] %v309_v3 }
  0x3d   : > { %v321_v8 = vadd.f32 %v320_v7, %v319_v6 }
  0x3f   : > { %322 = vadd.xlane.f32.xlu0 %v321_v8 }
  0x43   : > { %v330_v11 = vld.sshfl [vmem:[#allocation1] sm:$0xff pattern:$0x73625140]  ;;  %v331_v12 = vld.sshfl [vmem:[#allocation1 + $0x8] sm:$0xff pattern:$0x73625140] }
  0x44   : > { %343 = vst [vmem:[#allocation1] ss:$4 sm:$0xff] %v310_v10  ;;  %v334_v13 = vsel %vm318_vm1, %v330_v11, 0.0  ;;  %v335_v14 = vsel %vm318_vm1, %v331_v12, 0.0 }
  0x45   : > { %v336_v15 = vadd.f32 %v335_v14, %v334_v13 }
  0x47   : > { %337 = vadd.xlane.f32.xlu0 %v336_v15 }
  0x4b   : > { %v344_v17 = vld.sshfl [vmem:[#allocation1] sm:$0xff pattern:$0x73625140]  ;;  %v345_v18 = vld.sshfl [vmem:[#allocation1 + $0x8] sm:$0xff pattern:$0x73625140] }
  0x4c   : > { %358 = vst [vmem:[#allocation1] ss:$4 sm:$0xff] %v356_v16  ;;  %v348_v19 = vsel %vm318_vm1, %v344_v17, 0.0  ;;  %v349_v20 = vsel %vm318_vm1, %v345_v18, 0.0 }
  0x4d   : > { %v350_v21 = vadd.f32 %v349_v20, %v348_v19 }
  0x4f   : > { %351 = vadd.xlane.f32.xlu1 %v350_v21 }
  0x53   : > { %v359_v23 = vld.sshfl [vmem:[#allocation1] sm:$0xff pattern:$0x73625140]  ;;  %v360_v24 = vld.sshfl [vmem:[#allocation1 + $0x8] sm:$0xff pattern:$0x73625140] }
  0x54   : > { %373 = vst [vmem:[#allocation1] ss:$4 sm:$0xff] %v371_v22  ;;  %v363_v25 = vsel %vm318_vm1, %v359_v23, 0.0  ;;  %v364_v26 = vsel %vm318_vm1, %v360_v24, 0.0 }
  0x55   : > { %v365_v27 = vadd.f32 %v364_v26, %v363_v25 }
  0x57   : > { %366 = vadd.xlane.f32.xlu1 %v365_v27 }
  0x5b   : > { %v374_v29 = vld.sshfl [vmem:[#allocation1] sm:$0xff pattern:$0x73625140]  ;;  %v375_v30 = vld.sshfl [vmem:[#allocation1 + $0x8] sm:$0xff pattern:$0x73625140] }
  0x5c   : > { %v378_v31 = vsel %vm318_vm1, %v374_v29, 0.0  ;;  %v379_v32 = vsel %vm318_vm1, %v375_v30, 0.0  ;;  %388 = vst [vmem:[#allocation1] ss:$4 sm:$0xff] %v386_v28 }
  0x5d   : > { %v380_v33 = vadd.f32 %v379_v32, %v378_v31 }
  0x5f   : > { %381 = vadd.xlane.f32.xlu2 %v380_v33 }
  0x63   : > { %v389_v34 = vld.sshfl [vmem:[#allocation1] sm:$0xff pattern:$0x73625140]  ;;  %v390_v35 = vld.sshfl [vmem:[#allocation1 + $0x8] sm:$0xff pattern:$0x73625140] }
  0x64   : > { %v393_v36 = vsel %vm318_vm1, %v389_v34, 0.0  ;;  %v394_v37 = vsel %vm318_vm1, %v390_v35, 0.0 }
  0x65   : > { %v395_v38 = vadd.f32 %v394_v37, %v393_v36 }
  0x67   : > { %396 = vadd.xlane.f32.xlu2 %v395_v38 }
  0xb2   : > { %v323_v40 = vpop.xlane.xlu0 %322 }
  0xb3   : > { %v324_v41 = vadd.f32 %v323_v40, %v311_v39 }
  0xb5   : > { %326 = vst.msk [vmem:[#allocation2] sm:$0x3] %vm325_vm2, %v324_v41 }
  0xba   : > { %v338_v43 = vpop.xlane.xlu0 %337 }
  0xbb   : > { %v339_v44 = vadd.f32 %v338_v43, %v327_v42 }
  0xbc   : > { %v405_v57 = vld [vmem:[#allocation2] sm:$0x3] (%p400_p1) }
  0xbd   : > { %340 = vst.msk [vmem:[#allocation3] sm:$0x3] %vm325_vm2, %v339_v44  ;;  %709 = vrcp.f32 (%p400_p1), %v405_v57  ;;  %v417_v60 = vand.u32 (%p400_p1), 2147483648, %v405_v57  ;;  %vm411_vm3 = vweird.f32 (%p400_p1), %v405_v57  ;;  %v415_v62 = vand.u32 (%p400_p1), 2147483647, %v405_v57 }
  0xbf   : > { %v418_v0 = vor.u32 (%p400_p1), 1.1754944e-38, %v417_v60  ;;  %vm416_vm6 = vcmp.eq.f32.partialorder (%p400_p1), %v415_v62, 8.507059e+37 }
  0xc2   : > { %v352_v46 = vpop.xlane.xlu1 %351 }
  0xc3   : > { %v353_v47 = vadd.f32 %v352_v46, %v341_v45  ;;  %v710_v58 = vpop.eup (%p400_p1), %709 }
  0xc4   : > { %v407_v59 = vmul.f32 (%p400_p1), %v710_v58, %v405_v57  ;;  %vm412_vm4 = vweird.f32 (%p400_p1), %v710_v58  ;;  %v421_v2 = vld [vmem:[#allocation3] sm:$0x3] (%p400_p1) }
  0xc5   : > { %354 = vst.msk [vmem:[#allocation4] sm:$0x3] %vm325_vm2, %v353_v47  ;;  %vm413_vm5 = vmor (%p400_p1), %vm411_vm3, %vm412_vm4 }
  0xc6   : > { %v408_v61 = vsub.f32 (%p400_p1), 1.0, %v407_v59 }
  0xc8   : > { %v409_v63 = vmul.f32 (%p400_p1), %v710_v58, %v408_v61 }
  0xca   : > { %v367_v49 = vpop.xlane.xlu1 %366  ;;  %v410_v1 = vadd.f32 (%p400_p1), %v710_v58, %v409_v63 }
  0xcb   : > { %v368_v50 = vadd.f32 %v367_v49, %v355_v48 }
  0xcc   : > { %v422_v3 = vld [vmem:[#allocation4] sm:$0x3] (%p400_p1)  ;;  %v414_v4 = vsel (%p400_p1), %vm413_vm5, %v710_v58, %v410_v1 }
  0xcd   : > { %369 = vst.msk [vmem:[#allocation5] sm:$0x3] %vm325_vm2, %v368_v50  ;;  %v1017_v5 = vsel (%p400_p1), %vm416_vm6, %v418_v0, %v414_v4 }
  0xce   : > { %v423_v6 = vmul.f32 (%p400_p1), %v421_v2, %v1017_v5  ;;  %v424_v7 = vmul.f32 (%p400_p1), %v422_v3, %v1017_v5 }
  0xd0   : > { %v430_v8 = vmul.f32 (%p400_p1), 1024.0, %v423_v6  ;;  %v435_v9 = vmul.f32 (%p400_p1), 2.0, %v423_v6  ;;  %v442_v11 = vmul.f32 (%p400_p1), 2.0, %v424_v7  ;;  %v445_v12 = vmul.f32 (%p400_p1), 1024.0, %v424_v7 }
  0xd1   : > { %v426_v46 = vmul.f32 (%p400_p1), %v424_v7, %v421_v2 }
  0xd2   : > { %v382_v52 = vpop.xlane.xlu2 %381  ;;  %v436_v13 = vmul.f32 (%p400_p1), %v435_v9, %v421_v2  ;;  %v438_v14 = vmul.f32 (%p400_p1), %v430_v8, %v423_v6  ;;  %v443_v16 = vmul.f32 (%p400_p1), %v442_v11, %v422_v3  ;;  %v446_v17 = vmul.f32 (%p400_p1), %v445_v12, %v424_v7 }
  0xd3   : > { %v383_v53 = vadd.f32 %v382_v52, %v370_v51  ;;  %v428_v51 = vmul.f32 (%p400_p1), %v423_v6, %v422_v3 }
  0xd4   : > { %v425_v48 = vld [vmem:[#allocation5] sm:$0x3] (%p400_p1) }
  0xd5   : > { %384 = vst.msk [vmem:[#allocation6] sm:$0x3] %vm325_vm2, %v383_v53  ;;  %v427_v50 = vsub.f32 (%p400_p1), %v425_v48, %v426_v46  ;;  %v431_v53 = vmul.f32 (%p400_p1), %v430_v8, %v424_v7 }
  0xd7   : > { %v429_v52 = vsub.f32 (%p400_p1), %v427_v50, %v428_v51 }
  0xd9   : > { %404 = sbr.rel (!%p400_p1) target bundleno = 284 (0x11c), region = 52 }
  0xda   : > { %v397_v55 = vpop.xlane.xlu2 %396 }
  0xdb   : > { %v398_v56 = vadd.f32 %v397_v55, %v385_v54 }
  0xdc   : > { %v434_v10 = vld [vmem:[#allocation6] sm:$0x3] (%p400_p1) }
  0xdd   : > { %399 = vst.msk [vmem:[#allocation7] sm:$0x3] %vm325_vm2, %v398_v56  ;;  %v437_v18 = vsub.f32 (%p400_p1), %v434_v10, %v436_v13  ;;  %v432_v56 = vadd.f32 (%p400_p1), %v431_v53, %v429_v52 }
  0xdf   : > { %v439_v20 = vadd.f32 %v438_v14, %v437_v18  ;;  %v433_v62 = vmul.f32 %v432_v56, %v1017_v5 }
  0xe1   : > { %v440_v22 = vmul.f32 %v439_v20, %v1017_v5 }
  0xe3   : > { %v449_v24 = vmax.f32 %v440_v22, 0.0 }
  0xe4   : > { %v441_v15 = vld [vmem:[#allocation7] sm:$0x3] }
  0xe5   : > { %v444_v19 = vsub.f32 %v441_v15, %v443_v16  ;;  %711 = vrsqrt.f32 %v449_v24  ;;  %vm458_vm7 = vcmp.eq.f32.partialorder %v449_v24, inf  ;;  %v461_v37 = vand.u32 2147483648, %v449_v24 }
  0xe6   : > { %vm460_vm8 = vcmp.eq.f32.partialorder %v449_v24, 0.0 }
  0xe7   : > { %v447_v21 = vadd.f32 %v446_v17, %v444_v19 }
  0xe9   : > { %v448_v23 = vmul.f32 %v447_v21, %v1017_v5 }
  0xeb   : > { %v450_v25 = vmax.f32 %v448_v23, 0.0  ;;  %v712_v26 = vpop.eup %711 }
  0xec   : > { %v452_v28 = vmul.f32 %v712_v26, %v449_v24 }
  0xed   : > { %713 = vrsqrt.f32 %v450_v25  ;;  %vm470_vm9 = vcmp.eq.f32.partialorder %v450_v25, inf  ;;  %v473_v40 = vand.u32 2147483648, %v450_v25  ;;  %vm472_vm10 = vcmp.eq.f32.partialorder %v450_v25, 0.0 }
  0xee   : > { %v453_v30 = vmul.f32 %v712_v26, %v452_v28 }
  0xf0   : > { %v454_v32 = vmul.f32 0.5, %v453_v30 }
  0xf2   : > { %v455_v34 = vsub.f32 1.5, %v454_v32 }
  0xf3   : > { %v714_v27 = vpop.eup %713 }
  0xf4   : > { %v464_v29 = vmul.f32 %v714_v27, %v450_v25  ;;  %v456_v36 = vmul.f32 %v712_v26, %v455_v34 }
  0xf6   : > { %v465_v31 = vmul.f32 %v714_v27, %v464_v29  ;;  %v457_v39 = vmul.f32 %v456_v36, %v449_v24 }
  0xf8   : > { %v466_v33 = vmul.f32 0.5, %v465_v31  ;;  %v459_v42 = vsel %vm458_vm7, %v449_v24, %v457_v39 }
  0xf9   : > { %v462_v43 = vsel %vm460_vm8, %v461_v37, %v459_v42 }
  0xfa   : > { %v467_v35 = vsub.f32 1.5, %v466_v33 }
  0xfc   : > { %v468_v38 = vmul.f32 %v714_v27, %v467_v35 }
  0xfe   : > { %v469_v41 = vmul.f32 %v468_v38, %v450_v25 }
 0x100   : > { %v471_v44 = vsel %vm470_vm9, %v450_v25, %v469_v41 }
 0x101   : > { %v474_v45 = vsel %vm472_vm10, %v473_v40, %v471_v44 }
 0x102   : > { %v475_v47 = vmul.f32 %v474_v45, %v462_v43 }
 0x104   : > { %v476_v49 = vadd.f32 1e-08, %v475_v47 }
 0x106   : > { %715 = vrcp.f32 %v476_v49  ;;  %v488_v57 = vand.u32 2147483648, %v476_v49  ;;  %vm482_vm11 = vweird.f32 %v476_v49  ;;  %v486_v59 = vand.u32 2147483647, %v476_v49 }
 0x108   : > { %v489_v61 = vor.u32 1.1754944e-38, %v488_v57  ;;  %vm487_vm14 = vcmp.eq.f32.partialorder %v486_v59, 8.507059e+37 }
 0x10c   : > { %v716_v54 = vpop.eup %715 }
 0x10d   : > { %v478_v55 = vmul.f32 %v716_v54, %v476_v49  ;;  %vm483_vm12 = vweird.f32 %v716_v54 }
 0x10e   : > { %vm484_vm13 = vmor %vm482_vm11, %vm483_vm12 }
 0x10f   : > { %v479_v58 = vsub.f32 1.0, %v478_v55 }
 0x111   : > { %v480_v60 = vmul.f32 %v716_v54, %v479_v58 }
 0x113   : > { %v481_v63 = vadd.f32 %v716_v54, %v480_v60 }
 0x115   : > { %v485_v0 = vsel %vm484_vm13, %v716_v54, %v481_v63 }
 0x116   : > { %v490_v1 = vsel %vm487_vm14, %v489_v61, %v485_v0 }
 0x117   : > { %v491_v2 = vmul.f32 %v490_v1, %v433_v62 }
 0x119   : > { %v629_v3 = vclamps-f32 %v491_v2, 1.0 }
 0x11b   : > { %494 = vst.msk [vmem:[%s1049_s3] sm:$0x3] %vm325_vm2, %v629_v3 }
 0x11c PF: > { %s19_s17 = sadd.s32 1, %s865_s17   ;;  %s1058_s12 = smov %s849_s13 }
 0x11d   : > { %p16_p3 = scmp.ge.s32.totalorder %s19_s17, 6   ;;  %s1059_s13 = smov %s853_s14 }
 0x11e   : > { %s1060_s14 = smov %s961_s7  ;;  %s1061_s15 = smov %s861_s16 }
 0x11f   : > { %s1062_s16 = smov %s1064_s27  ;;  %18 = sbr.rel (!%p16_p3) target bundleno = 8 (0x8), region = 98 }
 0x124   :  { %514 = vsyncpa [#allocation9], 1 }
 0x125   :  { %516 = vsyncpa [#allocation9 + $0x1], 1 }
 0x126   :  { %517 = vsyncpa [#allocation11], 1 }
 0x127   :  { %519 = vsyncpa [#allocation11 + $0x1], 1 }

</bundles_post_ra>
